<compile_context>
chip_gen: v5e
topology: v5e:2x2
jax: 0.10.0
libtpu: 0.0.40
codegen_flags: <defaults>
</compile_context>

<pallas_src>
import jax
import jax.numpy as jnp
from jax import lax
from jax.experimental import pallas as pl
from jax.experimental.pallas import tpu as pltpu


def _round_up(x, m):
    return ((x + m - 1) // m) * m


def _arranger_embed_kernel(ids_ref, emb_ref, mel_ref, out_ref):
    # ids_ref : VMEM (Bb, 1)      int32
    # emb_ref : VMEM (V, H)       full embedding table, resident (constant block)
    # mel_ref : VMEM (Bb, T, H)   mel tile for this grid step
    # out_ref : VMEM (Bb, 1+T, H) concatenated output tile

    # Bulk copy of the mel slab into rows 1..T of the output block.
    # TODO(synk): on v7x (3.2 TB/s HBM, 64 MiB VMEM) replace this VMEM relay
    # (+1-sublane misaligned stores) with a manual pltpu.make_async_copy of the
    # mel HBM slab (memory_space=pl.ANY) directly into out_ref.at[:, 1:, :]; on
    # v5e/v6e the relay is hidden under HBM bandwidth.
    out_ref[:, 1:, :] = mel_ref[...]

    # Vectorised embedding gather: one_hot(ids) @ table on the MXU, then a
    # single lane-dense store to sequence position 0.  Non-matching ids give a
    # zero row -> no OOB table read is possible inside the kernel.
    ids = ids_ref[...]                                        # (Bb, 1) int32
    bb = ids.shape[0]
    v = emb_ref.shape[0]
    col = lax.broadcasted_iota(jnp.int32, (bb, v), 1)         # (Bb, V)
    onehot = (col == ids).astype(emb_ref.dtype)               # (Bb, V)
    rows = jnp.dot(onehot, emb_ref[...],
                   preferred_element_type=jnp.float32)        # (Bb, H) exact gather
    out_ref[:, 0:1, :] = rows[:, None, :].astype(out_ref.dtype)


def _pick_block_b(B, per_b_in_vmem, per_b_out_vmem, table_vmem,
                  target_step_bytes, vmem_budget_bytes):
    """Pick the batch block size by bytes, clamped to the VMEM budget."""
    margin = 2 << 20                                # Mosaic internal scratch, ids blocks
    avail = vmem_budget_bytes - 2 * table_vmem - margin
    if avail <= 0:
        return None
    cap = avail // (2 * (per_b_in_vmem + per_b_out_vmem))   # double-buffered blocks
    if cap < 8:
        return None                                 # even Bb=8 does not fit
    bb = max(8, -(-target_step_bytes // per_b_in_vmem))     # ceil-div, >= 8
    bb = min(bb, cap, _round_up(B, 8))
    bb = (bb // 8) * 8                              # multiple of 8 (ids block second-minor)
    if bb < 8:
        return None
    # Prefer a block that divides B exactly (avoids the wrapper-side pad copy),
    # but never shrink by more than 2x to find one.
    for cand in range(bb, 7, -8):
        if B % cand == 0 and cand * 2 >= bb:
            return cand
    return bb


def _xla_forward(ids2d, mel_db, emb_table):
    """Plain-XLA fallback (also the reference semantics)."""
    return jnp.concatenate([emb_table[ids2d], mel_db], axis=-2)


def arranger_embedding(arranger_id, mel_db, emb_table, *,
                       target_step_bytes=1 << 20,
                       vmem_budget_bytes=24 << 20,   # v7x-safe (64 MiB physical VMEM)
                       small_bytes_threshold=4 << 20,
                       force_pallas=False):
    """Pallas implementation of ArrangerEmbedding.forward.

    arranger_id: (B, 1) int
    mel_db     : (B, T, H) float
    emb_table  : (V, H) float  (same dtype as mel_db, like torch.cat requires)
    returns    : (B, 1 + T, H)
    """
    B, n_ids = arranger_id.shape
    assert n_ids == 1, "one arranger id per batch element"
    Bm, T, H = mel_db.shape
    V, He = emb_table.shape
    assert Bm == B and He == H
    assert emb_table.dtype == mel_db.dtype, (
        "embedding table and mel_db must share a dtype (torch.cat semantics)")
    # NOTE: H is lane-dense (multiple of 128) for the module default H=128; other
    # H still work but the store path uses masked partial stores.

    ids2d = jnp.clip(arranger_id.reshape(B, 1).astype(jnp.int32), 0, V - 1)

    itemsize = jnp.dtype(mel_db.dtype).itemsize
    total_bytes = (B * T * H + B * (1 + T) * H + V * H) * itemsize
    if (not force_pallas) and total_bytes < small_bytes_threshold:
        # Launch + per-step overhead dwarfs the data movement at these sizes.
        return _xla_forward(ids2d, mel_db, emb_table)

    # Honest per-batch VMEM footprints (sublane/lane padded).
    lanes_h = _round_up(H, 128)
    per_b_in_vmem = _round_up(T, 8) * lanes_h * itemsize
    per_b_out_vmem = _round_up(1 + T, 8) * lanes_h * itemsize
    table_vmem = _round_up(V, 8) * lanes_h * jnp.dtype(emb_table.dtype).itemsize

    bb = _pick_block_b(B, per_b_in_vmem, per_b_out_vmem, table_vmem,
                       target_step_bytes, vmem_budget_bytes)
    if bb is None:
        # TODO(synk): for very large T*H (or V*H) add a T grid axis instead of
        # full-T blocks; until then fall back to XLA rather than overflow VMEM.
        return _xla_forward(ids2d, mel_db, emb_table)

    # Pad batch to a multiple of the block (usually a no-op because bb | B).
    B_pad = _round_up(B, bb)
    mel = mel_db
    ids = ids2d
    if B_pad != B:
        ids = jnp.pad(ids, ((0, B_pad - B), (0, 0)))
        mel = jnp.pad(mel, ((0, B_pad - B), (0, 0), (0, 0)))

    grid = (B_pad // bb,)

    # VMEM budget: double-buffered mel/out/ids blocks + (double-buffered) table.
    # TODO(synk): mark the constant-index table spec single-buffered
    # (pipeline_mode=pl.Buffered(1)); the budget below already counts 2 buffers.
    ids_blk_vmem = bb * 128 * 4
    vmem_needed = (2 * table_vmem
                   + 2 * bb * (per_b_in_vmem + per_b_out_vmem)
                   + 2 * ids_blk_vmem)
    vmem_limit = int(max(32 << 20, vmem_needed + (8 << 20)))

    bytes_accessed = (V * H * jnp.dtype(emb_table.dtype).itemsize   # table (read once)
                      + B_pad * T * H * itemsize                    # mel read
                      + B_pad * (1 + T) * H * itemsize              # output write
                      + B_pad * 4)                                  # ids
    cost = pl.CostEstimate(flops=2 * B_pad * V * H, transcendentals=0,
                           bytes_accessed=int(bytes_accessed))

    grid_spec = pltpu.PrefetchScalarGridSpec(
        num_scalar_prefetch=0,
        grid=grid,
        in_specs=[
            pl.BlockSpec((bb, 1), lambda i: (i, 0)),        # ids per block
            pl.BlockSpec((V, H), lambda i: (0, 0)),         # table, DMA'd once
            pl.BlockSpec((bb, T, H), lambda i: (i, 0, 0)),  # mel tile
        ],
        out_specs=pl.BlockSpec((bb, 1 + T, H), lambda i: (i, 0, 0)),
    )

    out = pl.pallas_call(
        _arranger_embed_kernel,
        out_shape=jax.ShapeDtypeStruct((B_pad, 1 + T, H), mel.dtype),
        grid_spec=grid_spec,
        compiler_params=pltpu.CompilerParams(
            # TODO(synk): on v7x use pltpu.CORE_PARALLEL on this axis (or
            # pl.core_map over a 2-TC mesh) so both TensorCores drive DMA;
            # plain "parallel" is kept here for single-TC portability.
            dimension_semantics=("parallel",),
            vmem_limit_bytes=vmem_limit,
        ),
        cost_estimate=cost,
    )(ids, emb_table, mel)

    return out[:B] if B_pad != B else out


if __name__ == "__main__":
    # Module hyper-parameters (defaults from __init__).
    ARRANGER_IDS = 256
    HIDDEN = 128

    key = jax.random.PRNGKey(0)
    k_emb, k_ids1, k_mel1, k_ids2, k_mel2 = jax.random.split(key, 5)

    # Deterministic parameters (nn.Embedding ~ N(0,1) weights).
    emb_table = jax.random.normal(k_emb, (ARRANGER_IDS, HIDDEN), jnp.float32)

    # Case 1: multi-step grid (small target_step_bytes to exercise pipelining).
    B1, T1 = 16, 32
    ids1 = jax.random.randint(k_ids1, (B1, 1), 0, ARRANGER_IDS, jnp.int32)
    mel1 = jax.random.normal(k_mel1, (B1, T1, HIDDEN), jnp.float32)
    out1 = arranger_embedding(ids1, mel1, emb_table,
                              target_step_bytes=32 << 10, force_pallas=True)
    out1 = jax.block_until_ready(out1)
    ref1 = jnp.concatenate([emb_table[ids1], mel1], axis=-2)
    assert out1.shape == (B1, 1 + T1, HIDDEN), out1.shape
    assert jnp.allclose(out1, ref1), "case 1 mismatch vs reference"

    # Case 2: batch not a multiple of the block (exercises the pad path).
    B2, T2 = 3, 8
    ids2 = jax.random.randint(k_ids2, (B2, 1), 0, ARRANGER_IDS, jnp.int32)
    mel2 = jax.random.normal(k_mel2, (B2, T2, HIDDEN), jnp.float32)
    out2 = arranger_embedding(ids2, mel2, emb_table, force_pallas=True)
    out2 = jax.block_until_ready(out2)
    ref2 = jnp.concatenate([emb_table[ids2], mel2], axis=-2)
    assert out2.shape == (B2, 1 + T2, HIDDEN), out2.shape
    assert jnp.allclose(out2, ref2), "case 2 mismatch vs reference"

    print("KERNEL_OK")
</pallas_src>

<mosaic_0001>
module attributes {stable_mosaic.version = 11 : i64} {
  func.func @_arranger_embed_kernel(%arg0: i32, %arg1: memref<8x1xi32, #tpu.memory_space<vmem>>, %arg2: memref<256x128xf32, #tpu.memory_space<vmem>>, %arg3: memref<8x32x128xf32, #tpu.memory_space<vmem>>, %arg4: memref<8x33x128xf32, #tpu.memory_space<vmem>>) attributes {dimension_semantics = [#tpu.dimension_semantics<parallel>], iteration_bounds = array<i64: 2>, scalar_prefetch = 0 : i64, scratch_operands = 0 : i64, tpu.core_type = #tpu.core_type<tc>, window_params = [{transform_indices = @transform_0, window_bounds = array<i64: 8, 1>}, {pipeline_mode = #tpu.pipeline_mode<synchronous>, transform_indices = @transform_1, window_bounds = array<i64: 256, 128>}, {transform_indices = @transform_2, window_bounds = array<i64: 8, 32, 128>}, {transform_indices = @transform_3, window_bounds = array<i64: 8, 33, 128>}]} {
    %c0 = arith.constant 0 : index
    %c0_0 = arith.constant 0 : index
    %c0_1 = arith.constant 0 : index
    %0 = vector.load %arg3[%c0, %c0_0, %c0_1] : memref<8x32x128xf32, #tpu.memory_space<vmem>>, vector<8x32x128xf32>
    %c0_2 = arith.constant 0 : index
    %c1 = arith.constant 1 : index
    %c0_3 = arith.constant 0 : index
    %1 = vector.load %arg4[%c0_2, %c1, %c0_3] : memref<8x33x128xf32, #tpu.memory_space<vmem>>, vector<8x32x128xf32>
    tpu.vector_store %arg4[%c0_2, %c1, %c0_3], %0 {strides = array<i32>} : memref<8x33x128xf32, #tpu.memory_space<vmem>>, vector<8x32x128xf32>,
    %c0_4 = arith.constant 0 : index
    %c0_5 = arith.constant 0 : index
    %2 = vector.load %arg1[%c0_4, %c0_5] : memref<8x1xi32, #tpu.memory_space<vmem>>, vector<8x1xi32>
    %3 = tpu.iota {dimensions = array<i32: 1>} : vector<8x256xi32>
    %4 = vector.broadcast %2 : vector<8x1xi32> to vector<8x256xi32>
    %5 = arith.cmpi eq, %3, %4 : vector<8x256xi32>
    %6 = arith.extui %5 : vector<8x256xi1> to vector<8x256xi32>
    %7 = arith.sitofp %6 : vector<8x256xi32> to vector<8x256xf32>
    %c0_6 = arith.constant 0 : index
    %c0_7 = arith.constant 0 : index
    %8 = vector.load %arg2[%c0_6, %c0_7] : memref<256x128xf32, #tpu.memory_space<vmem>>, vector<256x128xf32>
    %cst = arith.constant dense<0.000000e+00> : vector<8x128xf32>
    %9 = tpu.matmul %7, %8, %cst {dimension_numbers = #tpu.dot_dimension_numbers<[1], [0], [0], [1], [0, 0, 1, 1], [], []>} : vector<8x256xf32>, vector<256x128xf32>, vector<8x128xf32> -> vector<8x128xf32>
    %10 = vector.shape_cast %9 : vector<8x128xf32> to vector<8x1x128xf32>
    %c0_8 = arith.constant 0 : index
    %c0_9 = arith.constant 0 : index
    %c0_10 = arith.constant 0 : index
    %11 = vector.load %arg4[%c0_8, %c0_9, %c0_10] : memref<8x33x128xf32, #tpu.memory_space<vmem>>, vector<8x1x128xf32>
    tpu.vector_store %arg4[%c0_8, %c0_9, %c0_10], %10 {strides = array<i32>} : memref<8x33x128xf32, #tpu.memory_space<vmem>>, vector<8x1x128xf32>,
    return
  }
  func.func @transform_0(%arg0: i32) -> (i32, i32) {
    %c0_i32 = arith.constant 0 : i32
    %c0_i32_0 = arith.constant 0 : i32
    return %arg0, %c0_i32 : i32, i32
  }
  func.func @transform_1(%arg0: i32) -> (i32, i32) {
    %c0_i32 = arith.constant 0 : i32
    %c0_i32_0 = arith.constant 0 : i32
    %c0_i32_1 = arith.constant 0 : i32
    return %c0_i32, %c0_i32_0 : i32, i32
  }
  func.func @transform_2(%arg0: i32) -> (i32, i32, i32) {
    %c0_i32 = arith.constant 0 : i32
    %c0_i32_0 = arith.constant 0 : i32
    %c0_i32_1 = arith.constant 0 : i32
    return %arg0, %c0_i32, %c0_i32_0 : i32, i32, i32
  }
  func.func @transform_3(%arg0: i32) -> (i32, i32, i32) {
    %c0_i32 = arith.constant 0 : i32
    %c0_i32_0 = arith.constant 0 : i32
    %c0_i32_1 = arith.constant 0 : i32
    return %arg0, %c0_i32, %c0_i32_0 : i32, i32, i32
  }
}

</mosaic_0001>

<bundles_post_ra>
// kernel: tpu_custom_call.1
= control target key start
LH: loop header
LB: loop body
LE: loop exit
PB: predicated region body
PF: predicated region fallthrough
CT: control target
= control target key end

     0   :  { %8 = vsyncpa [#allocation3], 0  ;;  %s890_s0 = inlined_call_operand.vmem [shape: s32[16,1], index: 0, kind: input, shape index: {}]   ;;  %s891_s1 = inlined_call_operand.hbm [shape: f32[256,128], index: 1, kind: input, shape index: {}]   ;;  %s892_s2 = inlined_call_operand.hbm [shape: f32[16,32,128], index: 2, kind: input, shape index: {}]   ;;  %s893_s3 = inlined_call_operand.vmem [shape: f32[16,33,128], index: 3, kind: output, shape index: {}]  }
   0x1   :  { %9 = vsyncpa [#allocation5], 0 }
   0x2   :  { %11 = vsyncpa [#allocation5 + $0x1], 0  ;;  %s701_s12 = smov 0   ;;  %s703_s13 = smov 0  }
   0x3   :  { %s705_s14 = smov 0   ;;  %s707_s15 = smov 0  }
   0x4 LB: > { %s720_s16 = sadd.s32 4294967295, %s674_s15   ;;  %p84_p0 = scmp.ne.s32.totalorder %s666_s13, %s662_s12  ;;  %s674_s15 = sphi %s707_s15, %s900_s15   ;;  %s670_s14 = sphi %s705_s14, %s899_s14   ;;  %s666_s13 = sphi %s703_s13, %s898_s13   ;;  %s662_s12 = sphi %s701_s12, %s897_s12  }
   0x5   : > { %p85_p1 = scmp.eq.s32.totalorder %s720_s16, 0  ;;  %p499_p2 = scmp.ge.s32.totalorder %s674_s15, 1 }
   0x6   : > { %p121_p3 = scmp.lt.s32.totalorder %s674_s15, 3  ;;  %s132_s20 = sshll.u32 %s891_s1, 4  ;;  %s133_s20 = int_to_ptr.hbm [resolvable:$true] %s132_s20 }
   0x7   : > { %p728_p4 = por %p85_p1, %p84_p0  ;;  %s676_s22 = smov [#allocation2]  }
   0x8   : > { %p735_p5 = pnand %p499_p2, %p121_p3  ;;  %s134_s23 = sshll.u32 %s676_s22, 4  ;;  %s135_s23 = int_to_ptr.vmem [resolvable:$true] %s134_s23 }
   0x9   : > { %s744_s24 = sadd.s32 1, %s674_s15   ;;  %s677_s25 = smov 128  }
   0xa   : > { %p527_p6 = pneg %p735_p5  ;;  %s678_s26 = smov 8  }
   0xb   : > { %s68_s27 = ssub.s32 %s674_s15, %s744_s24  ;;  %s71_s28 = sadd.s32 1, %s670_s14 }
   0xc   : > { %p528_p7 = pnand %p527_p6, %p85_p1  ;;  %p69_p8 = scmp.eq.s32.totalorder %s68_s27, 0 }
   0xd   : > { %p78_p9 = scmp.ne.s32.totalorder %s670_s14, %s666_s13  ;;  %p79_p10 = scmp.eq.s32.totalorder %s674_s15, 0 }
   0xe   : > { %530 = dma.hbm_to_vmem [thread:$0]  (!%p528_p7), %s133_s20, 4096, %s135_s23, [#allocation3], %s677_s25, %s677_s25, %s678_s26  }
   0xf   : > { %p536_p11 = scmp.lt.s32.totalorder %s674_s15, 2  ;;  %p80_p12 = por %p79_p10, %p78_p9 }
  0x10   : > { %s757_s29 = scalar_select %p69_p8, %s670_s14, %s71_s28  }
  0x11   : > { %s155_s30 = sand.u32 1, %s670_s14   ;;  %s519_s5 = sshll.u32 %s674_s15, 8 }
  0x12   : > { %s502_s4 = sshll.u32 %s155_s30, 8  ;;  %s165_s8 = scalar_lea.hbm %s892_s2, %s519_s5 }
  0x13   : > { %s159_s9 = scalar_lea.vmem [#allocation4], %s502_s4  ;;  %s166_s11 = sshll.u32 %s165_s8, 4  ;;  %s167_s11 = int_to_ptr.hbm [resolvable:$true] %s166_s11 }
  0x14   : > { %s168_s10 = sshll.u32 %s159_s9, 4  ;;  %p764_p13 = pnand %p536_p11, %p80_p12  ;;  %s169_s10 = int_to_ptr.vmem [resolvable:$true] %s168_s10 }
  0x15   : > { %s156_s18 = scalar_lea.sflag [#allocation5], %s155_s30  ;;  %s606_s19 = sshra.s32 %s167_s11, 4  ;;  %s607_s19 = int_to_ptr.hbm [resolvable:$true] %s606_s19 }
  0x16   : > { %s608_s20 = scalar_lea.hbm %s607_s19, 256  ;;  %p610_p2 = pneg %p764_p13 }
  0x17   : > { %p609_p0 = scmp.ne.s32.totalorder %s607_s19, %s608_s20  ;;  %s613_s23 = scalar_lea.hbm %s892_s2, 512 }
  0x18   : > { %p614_p7 = scmp.lt.s32.totalorder %s607_s19, %s892_s2  ;;  %p615_p8 = scmp.lt.s32.totalorder %s613_s23, %s608_s20 }
  0x19   : > { %p611_p3 = pnand %p610_p2, %p609_p0 }
  0x1a   : > { %p616_p9 = por %p615_p8, %p614_p7 }
  0x1b   : > { %p612_p6 = pneg %p611_p3 }
  0x1d   : > { %p617_p10 = pnand %p616_p9, %p612_p6 }
  0x1f   : > { %620 = shalt.err (!%p617_p10)
}
  0x20   : > { %534 = dma.hbm_to_vmem [thread:$0]  (!%p764_p13), %s167_s11, 4096, %s169_s10, %s156_s18, %s677_s25, %s677_s25, %s678_s26  }
  0x21   : > { %180 = sbr.rel (%p735_p5) target bundleno = 303 (0x12f), region = 32 }
  0x26   : > { %653 = dma.done.wait (%p85_p1), [#allocation3], 4096  }
  0x27   : > { %655 = vsyncadd (%p85_p1), [#allocation3], 4294963200  ;;  %s187_s30 = sand.u32 1, %s666_s13  }
  0x28   : > { %s508_s4 = sshll.u32 %s187_s30, 8  ;;  %s188_s5 = scalar_lea.sflag [#allocation5], %s187_s30 }
  0x29   : > { %s788_s6 = scalar_lea.vmem [#allocation4], %s508_s4 }
  0x2a   : > { %657 = dma.done.wait (%p728_p4), %s188_s5, 4096  }
  0x2b   : > { %659 = vsyncadd (%p728_p4), %s188_s5, 4294963200  ;;  %p220_p5 = scmp.lt.s32.totalorder %s720_s16, 1  ;;  %v679_v0 = vmov 0   ;;  %v324_v2 = vld [vmem:[#allocation2 + $0x78] sm:$0xff]  ;;  %v323_v4 = vld [vmem:[#allocation2 + $0x70] sm:$0xff]  ;;  %v297_v34 = vlaneseq  ;;  %v680_v38 = vmov 1.0  }
  0x2c   : > { %575 = vset.pattern.permute.xlu0 %v679_v0  ;;  %v340_v3 = vld [vmem:[#allocation2 + $0xf8] sm:$0xff]  ;;  %341 = vmatpush.msra.mxu0 %v324_v2  ;;  %v339_v5 = vld [vmem:[#allocation2 + $0xf0] sm:$0xff]  ;;  %v322_v6 = vld [vmem:[#allocation2 + $0x68] sm:$0xff]  ;;  %s510_s17 = sshll.u32 %s720_s16, 3 }
  0x2d   : > { %s221_s21 = scalar_select %p220_p5, %s720_s16, 1  ;;  %361 = vmatpush.msra.mxu1 %v340_v3  ;;  %v338_v7 = vld [vmem:[#allocation2 + $0xe8] sm:$0xff]  ;;  %v321_v8 = vld [vmem:[#allocation2 + $0x60] sm:$0xff]  ;;  %v320_v10 = vld [vmem:[#allocation2 + $0x58] sm:$0xff]  ;;  %v298_v35 = vand.u32 127, %v297_v34 }
  0x2e   : > { %342 = vmatpush.msra.mxu0 %v323_v4  ;;  %v337_v9 = vld [vmem:[#allocation2 + $0xe0] sm:$0xff]  ;;  %v336_v11 = vld [vmem:[#allocation2 + $0xd8] sm:$0xff]  ;;  %v319_v12 = vld [vmem:[#allocation2 + $0x50] sm:$0xff]  ;;  %p226_p1 = scmp.lt.s32.totalorder %s510_s17, 15 }
  0x2f   : > { %s509_s25 = sshll.u32 %s221_s21, 3  ;;  %362 = vmatpush.msra.mxu1 %v339_v5  ;;  %v335_v13 = vld [vmem:[#allocation2 + $0xd0] sm:$0xff]  ;;  %v318_v14 = vld [vmem:[#allocation2 + $0x48] sm:$0xff]  ;;  %v317_v16 = vld [vmem:[#allocation2 + $0x40] sm:$0xff]  ;;  %v299_v36 = vadd.s32 128, %v298_v35 }
  0x30   : > { %s223_s8 = scalar_lea.vmem %s890_s0, %s509_s25  ;;  %343 = vmatpush.msra.mxu0 %v322_v6  ;;  %v334_v15 = vld [vmem:[#allocation2 + $0xc8] sm:$0xff]  ;;  %v333_v17 = vld [vmem:[#allocation2 + $0xc0] sm:$0xff]  ;;  %v316_v18 = vld [vmem:[#allocation2 + $0x38] sm:$0xff]  ;;  %s902_s17 = smov (!%p226_p1, %s510_s17), 15 }
  0x31   : > { %v296_v1 = vld [vmem:[%s223_s8] sm:$0xff]  ;;  %363 = vmatpush.msra.mxu1 %v338_v7  ;;  %v332_v19 = vld [vmem:[#allocation2 + $0xb8] sm:$0xff]  ;;  %v315_v20 = vld [vmem:[#allocation2 + $0x30] sm:$0xff]  ;;  %s520_s9 = smul.u32 40, %s902_s17 }
  0x32   : > { %301 = vperm.xlu0 %575, %v296_v1   ;;  %344 = vmatpush.msra.mxu0 %v321_v8  ;;  %v331_v21 = vld [vmem:[#allocation2 + $0xb0] sm:$0xff]  ;;  %v314_v22 = vld [vmem:[#allocation2 + $0x28] sm:$0xff]  ;;  %v313_v24 = vld [vmem:[#allocation2 + $0x20] sm:$0xff] }
  0x33   : > { %364 = vmatpush.msra.mxu1 %v337_v9  ;;  %v330_v23 = vld [vmem:[#allocation2 + $0xa8] sm:$0xff]  ;;  %v329_v25 = vld [vmem:[#allocation2 + $0xa0] sm:$0xff]  ;;  %v312_v26 = vld [vmem:[#allocation2 + $0x18] sm:$0xff]  ;;  %s803_s12 = scalar_lea.vmem %s893_s3, %s520_s9 }
  0x34   : > { %345 = vmatpush.msra.mxu0 %v320_v10  ;;  %v328_v27 = vld [vmem:[#allocation2 + $0x98] sm:$0xff]  ;;  %v311_v28 = vld [vmem:[#allocation2 + $0x10] sm:$0xff]  ;;  %v310_v30 = vld [vmem:[#allocation2 + $0x8] sm:$0xff] }
  0x35   : > { %365 = vmatpush.msra.mxu1 %v336_v11  ;;  %v327_v29 = vld [vmem:[#allocation2 + $0x90] sm:$0xff]  ;;  %v326_v31 = vld [vmem:[#allocation2 + $0x88] sm:$0xff]  ;;  %v309_v32 = vld [vmem:[#allocation2] sm:$0xff] }
  0x36   : > { %346 = vmatpush.msra.mxu0 %v319_v12  ;;  %v325_v33 = vld [vmem:[#allocation2 + $0x80] sm:$0xff]  ;;  %v233_v40 = vld [vmem:[%s788_s6 + $0x8] sm:$0xff]  ;;  %v234_v41 = vld [vmem:[%s788_s6 + $0x10] sm:$0xff] }
  0x37   : > { %366 = vmatpush.msra.mxu1 %v335_v13  ;;  %v232_v39 = vld [vmem:[%s788_s6] sm:$0xff]  ;;  %v235_v42 = vld [vmem:[%s788_s6 + $0x18] sm:$0xff]  ;;  %265 = vst [vmem:[%s803_s12 + $0x9] sm:$0xff] %v233_v40  ;;  %v237_v44 = vld [vmem:[%s788_s6 + $0x28] sm:$0xff] }
  0x38   : > { %347 = vmatpush.msra.mxu0 %v318_v14  ;;  %264 = vst [vmem:[%s803_s12 + $0x1] sm:$0xff] %v232_v39  ;;  %v236_v43 = vld [vmem:[%s788_s6 + $0x20] sm:$0xff]  ;;  %v238_v45 = vld [vmem:[%s788_s6 + $0x30] sm:$0xff]  ;;  %v239_v46 = vld [vmem:[%s788_s6 + $0x38] sm:$0xff] }
  0x39   : > { %367 = vmatpush.msra.mxu1 %v334_v15  ;;  %266 = vst [vmem:[%s803_s12 + $0x11] sm:$0xff] %v234_v41  ;;  %v240_v47 = vld [vmem:[%s788_s6 + $0x40] sm:$0xff]  ;;  %v241_v48 = vld [vmem:[%s788_s6 + $0x48] sm:$0xff]  ;;  %v242_v49 = vld [vmem:[%s788_s6 + $0x50] sm:$0xff] }
  0x3a   : > { %348 = vmatpush.msra.mxu0 %v317_v16  ;;  %267 = vst [vmem:[%s803_s12 + $0x19] sm:$0xff] %v235_v42  ;;  %v243_v50 = vld [vmem:[%s788_s6 + $0x58] sm:$0xff]  ;;  %v244_v51 = vld [vmem:[%s788_s6 + $0x60] sm:$0xff]  ;;  %v245_v52 = vld [vmem:[%s788_s6 + $0x68] sm:$0xff] }
  0x3b   : > { %368 = vmatpush.msra.mxu1 %v333_v17  ;;  %268 = vst [vmem:[%s803_s12 + $0x29] sm:$0xff] %v236_v43  ;;  %v246_v53 = vld [vmem:[%s788_s6 + $0x70] sm:$0xff]  ;;  %v247_v54 = vld [vmem:[%s788_s6 + $0x78] sm:$0xff]  ;;  %v248_v55 = vld [vmem:[%s788_s6 + $0x80] sm:$0xff] }
  0x3c   : > { %349 = vmatpush.msra.mxu0 %v316_v18  ;;  %269 = vst [vmem:[%s803_s12 + $0x31] sm:$0xff] %v237_v44  ;;  %v249_v56 = vld [vmem:[%s788_s6 + $0x88] sm:$0xff]  ;;  %v250_v57 = vld [vmem:[%s788_s6 + $0x90] sm:$0xff]  ;;  %v251_v58 = vld [vmem:[%s788_s6 + $0x98] sm:$0xff] }
  0x3d   : > { %369 = vmatpush.msra.mxu1 %v332_v19  ;;  %270 = vst [vmem:[%s803_s12 + $0x39] sm:$0xff] %v238_v45  ;;  %v252_v59 = vld [vmem:[%s788_s6 + $0xa0] sm:$0xff]  ;;  %v253_v60 = vld [vmem:[%s788_s6 + $0xa8] sm:$0xff]  ;;  %v254_v61 = vld [vmem:[%s788_s6 + $0xb0] sm:$0xff] }
  0x3e   : > { %350 = vmatpush.msra.mxu0 %v315_v20  ;;  %271 = vst [vmem:[%s803_s12 + $0x41] sm:$0xff] %v239_v46  ;;  %v255_v62 = vld [vmem:[%s788_s6 + $0xb8] sm:$0xff]  ;;  %v256_v63 = vld [vmem:[%s788_s6 + $0xc0] sm:$0xff]  ;;  %v257_v0 = vld [vmem:[%s788_s6 + $0xc8] sm:$0xff] }
  0x3f   : > { %370 = vmatpush.msra.mxu1 %v331_v21  ;;  %272 = vst [vmem:[%s803_s12 + $0x51] sm:$0xff] %v240_v47  ;;  %v258_v1 = vld [vmem:[%s788_s6 + $0xd0] sm:$0xff]  ;;  %v259_v2 = vld [vmem:[%s788_s6 + $0xd8] sm:$0xff]  ;;  %v260_v3 = vld [vmem:[%s788_s6 + $0xe0] sm:$0xff] }
  0x40   : > { %351 = vmatpush.msra.mxu0 %v314_v22  ;;  %273 = vst [vmem:[%s803_s12 + $0x59] sm:$0xff] %v241_v48  ;;  %v261_v4 = vld [vmem:[%s788_s6 + $0xe8] sm:$0xff]  ;;  %v262_v5 = vld [vmem:[%s788_s6 + $0xf0] sm:$0xff]  ;;  %v263_v6 = vld [vmem:[%s788_s6 + $0xf8] sm:$0xff] }
  0x41   : > { %371 = vmatpush.msra.mxu1 %v330_v23  ;;  %274 = vst [vmem:[%s803_s12 + $0x61] sm:$0xff] %v242_v49 }
  0x42   : > { %352 = vmatpush.msra.mxu0 %v313_v24  ;;  %275 = vst [vmem:[%s803_s12 + $0x69] sm:$0xff] %v243_v50 }
  0x43   : > { %372 = vmatpush.msra.mxu1 %v329_v25  ;;  %276 = vst [vmem:[%s803_s12 + $0x79] sm:$0xff] %v244_v51 }
  0x44   : > { %353 = vmatpush.msra.mxu0 %v312_v26  ;;  %277 = vst [vmem:[%s803_s12 + $0x81] sm:$0xff] %v245_v52 }
  0x45   : > { %373 = vmatpush.msra.mxu1 %v328_v27  ;;  %278 = vst [vmem:[%s803_s12 + $0x89] sm:$0xff] %v246_v53 }
  0x46   : > { %354 = vmatpush.msra.mxu0 %v311_v28  ;;  %279 = vst [vmem:[%s803_s12 + $0x91] sm:$0xff] %v247_v54 }
  0x47   : > { %374 = vmatpush.msra.mxu1 %v327_v29  ;;  %280 = vst [vmem:[%s803_s12 + $0xa1] sm:$0xff] %v248_v55 }
  0x48   : > { %355 = vmatpush.msra.mxu0 %v310_v30  ;;  %281 = vst [vmem:[%s803_s12 + $0xa9] sm:$0xff] %v249_v56 }
  0x49   : > { %375 = vmatpush.msra.mxu1 %v326_v31  ;;  %282 = vst [vmem:[%s803_s12 + $0xb1] sm:$0xff] %v250_v57 }
  0x4a   : > { %356 = vmatpush.msra.mxu0 %v309_v32  ;;  %283 = vst [vmem:[%s803_s12 + $0xb9] sm:$0xff] %v251_v58 }
  0x4b   : > { %376 = vmatpush.msra.mxu1 %v325_v33  ;;  %284 = vst [vmem:[%s803_s12 + $0xc9] sm:$0xff] %v252_v59 }
  0x4c   : > { %285 = vst [vmem:[%s803_s12 + $0xd1] sm:$0xff] %v253_v60 }
  0x4d   : > { %286 = vst [vmem:[%s803_s12 + $0xd9] sm:$0xff] %v254_v61 }
  0x4e   : > { %287 = vst [vmem:[%s803_s12 + $0xe1] sm:$0xff] %v255_v62 }
  0x4f   : > { %288 = vst [vmem:[%s803_s12 + $0xf1] sm:$0xff] %v256_v63 }
  0x50   : > { %289 = vst [vmem:[%s803_s12 + $0xf9] sm:$0xff] %v257_v0 }
  0x51   : > { %290 = vst [vmem:[%s803_s12 + $0x101] sm:$0xff] %v258_v1 }
  0x52   : > { %291 = vst [vmem:[%s803_s12 + $0x109] sm:$0xff] %v259_v2 }
  0x53   : > { %292 = vst [vmem:[%s803_s12 + $0x119] sm:$0xff] %v260_v3 }
  0x54   : > { %293 = vst [vmem:[%s803_s12 + $0x121] sm:$0xff] %v261_v4 }
  0x55   : > { %294 = vst [vmem:[%s803_s12 + $0x129] sm:$0xff] %v262_v5 }
  0x56   : > { %295 = vst [vmem:[%s803_s12 + $0x131] sm:$0xff] %v263_v6 }
  0xa4   : > { %v302_v37 = vpop.permute.xlu0 %301 }
  0xa5   : > { %vm303_vm0 = vcmp.eq.s32.totalorder %v298_v35, %v302_v37  ;;  %vm304_vm1 = vcmp.eq.s32.totalorder %v299_v36, %v302_v37 }
  0xa6   : > { %514 = vmatmul.msk.f32.vlgmr.msra.gmra.mxu0 %vm303_vm0, %v680_v38  ;;  %515 = vmatmul.msk.f32.vlgmr.msra.gmra.mxu1 %vm304_vm1, %v680_v38 }
 0x123   : > { %v358_v7 = vpop.f32.mrf.mxu0  ;;  %v378_v8 = vpop.f32.mrf.mxu1 }
 0x124   : > { %v379_v9 = vadd.f32 %v378_v8, %v358_v7 }
 0x126   : > { %v382_v10 = vrot.slane %v379_v9, 1  ;;  %v383_v11 = vrot.slane %v379_v9, 2  ;;  %v384_v12 = vrot.slane %v379_v9, 3  ;;  %396 = vst [vmem:[%s803_s12] sm:$0x1] %v379_v9  ;;  %v385_v13 = vrot.slane %v379_v9, 4 }
 0x127   : > { %v386_v14 = vrot.slane %v379_v9, 5  ;;  %v387_v15 = vrot.slane %v379_v9, 6  ;;  %v388_v16 = vrot.slane %v379_v9, 7 }
 0x128   : > { %397 = vst [vmem:[%s803_s12 + $0x28] sm:$0x1] %v382_v10 }
 0x129   : > { %398 = vst [vmem:[%s803_s12 + $0x50] sm:$0x1] %v383_v11 }
 0x12a   : > { %399 = vst [vmem:[%s803_s12 + $0x78] sm:$0x1] %v384_v12 }
 0x12b   : > { %400 = vst [vmem:[%s803_s12 + $0xa0] sm:$0x1] %v385_v13 }
 0x12c   : > { %401 = vst [vmem:[%s803_s12 + $0xc8] sm:$0x1] %v386_v14 }
 0x12d   : > { %402 = vst [vmem:[%s803_s12 + $0xf0] sm:$0x1] %v387_v15 }
 0x12e   : > { %403 = vst [vmem:[%s803_s12 + $0x118] sm:$0x1] %v388_v16 }
 0x12f PF: > { %p14_p4 = scmp.ge.s32.totalorder %s744_s24, 4   ;;  %s897_s12 = smov %s666_s13 }
 0x130   : > { %s898_s13 = smov %s670_s14  ;;  %s899_s14 = smov %s757_s29 }
 0x131   : > { %s900_s15 = smov %s744_s24  ;;  %16 = sbr.rel (!%p14_p4) target bundleno = 4 (0x4), region = 80 }
 0x136   :  { %428 = vsyncpa [#allocation3], 1 }
 0x137   :  { %430 = vsyncpa [#allocation3 + $0x1], 1 }
 0x138   :  { %431 = vsyncpa [#allocation5], 1 }
 0x139   :  { %433 = vsyncpa [#allocation5 + $0x1], 1 }

</bundles_post_ra>
